<compile_context>
chip_gen: v6e
topology: v6e:2x2x1
jax: 0.10.0
libtpu: 0.0.40
codegen_flags: <defaults>
</compile_context>

<pallas_src>
import functools

import jax
import jax.numpy as jnp
from jax.experimental import pallas as pl
from jax.experimental.pallas import tpu as pltpu


# ---------------------------------------------------------------------------
# Kernel bodies
# ---------------------------------------------------------------------------

def _pgnn_compute(sub_flat, dists, feat, w_blk, wb_tiled, bh_tiled, e_h,
                  p_out, b_comb, out_ref):
    """Per-tile compute on lane-dense 2-D operands.

    sub_flat : (tn, K*D)  bf16  gathered neighbor features, flat per node
    dists    : (tn, K)    f32
    feat     : (tn, D)    bf16  self features
    w_blk    : (K*D, K*H) bf16  blockdiag_K(Wa)           (neighbor term)
    wb_tiled : (D,  K*H)  bf16  Wb tiled K times          (self term)
    bh_tiled : (1,  K*H)  f32   hidden bias tiled K times
    e_h      : (K,  K*H)  f32   0/1 expansion: dists -> per-(k, h) scale
    p_out    : (K*H, OW)  f32   fused projection (cols 0:K = wo, K:K+H = mean/K)
    b_comb   : (1,  OW)   f32   output bias (b_out in cols 0:K)
    """
    # Main MXU matmul: contraction K*D (=128), output K*H (=256), lane-dense.
    ga = jnp.dot(sub_flat, w_blk, preferred_element_type=jnp.float32)
    # Self-feature term, already tiled across the K anchor blocks (+ bias).
    gs = jnp.dot(feat, wb_tiled, preferred_element_type=jnp.float32) + bh_tiled
    # (x*d) @ Wa == d * (x @ Wa): broadcast d along the H lanes of each anchor
    # block with a tiny MXU matmul (avoids a fragile (tn,K,H) reshape/repeat).
    d_e = jnp.dot(dists, e_h, preferred_element_type=jnp.float32)
    msg = jnp.maximum(ga * d_e + gs, 0.0)                     # (tn, K*H) f32
    # Fused epilogue on the MXU: one lane-dense (tn, OW=128) slab packing
    # out_position (cols 0:K) and out_structure (cols K:K+H) -> unmasked
    # full-vreg stores.
    out = jnp.dot(msg, p_out, preferred_element_type=jnp.float32) + b_comb
    out_ref[...] = out.astype(out_ref.dtype)


def _pgnn_kernel_pregathered(sub_ref, dists_ref, feat_ref, w_blk_ref,
                             wb_tiled_ref, bh_tiled_ref, e_h_ref, p_out_ref,
                             b_comb_ref, out_ref):
    """Fallback variant: neighbor features gathered by XLA (lane-dense block)."""
    _pgnn_compute(sub_ref[...], dists_ref[...], feat_ref[...], w_blk_ref[...],
                  wb_tiled_ref[...], bh_tiled_ref[...], e_h_ref[...],
                  p_out_ref[...], b_comb_ref[...], out_ref)


def _pgnn_kernel_vmem_gather(idx_ref, dists_ref, feat_ref, table_ref,
                             w_blk_ref, wb_tiled_ref, bh_tiled_ref, e_h_ref,
                             p_out_ref, b_comb_ref, out_ref):
    """Preferred variant: VMEM-resident feature table + in-kernel row gather."""
    tn, k = idx_ref.shape
    d = table_ref.shape[1]
    sub = jnp.take(table_ref[...], idx_ref[...].reshape(-1), axis=0,
                   mode="clip")                                # (tn*K, D)
    _pgnn_compute(sub.reshape(tn, k * d), dists_ref[...], feat_ref[...],
                  w_blk_ref[...], wb_tiled_ref[...], bh_tiled_ref[...],
                  e_h_ref[...], p_out_ref[...], b_comb_ref[...], out_ref)


# ---------------------------------------------------------------------------
# Wrapper
# ---------------------------------------------------------------------------

def _choose_tile(n, tn_requested):
    """Node tile: multiple of 16 (bf16 sublane packing), capped so the grid has
    ~>=8 steps (pipeline warm-up + work for both v7x TensorCores)."""
    cap = max(16, (pl.cdiv(n, 8) // 16) * 16)
    tn = max(16, min(int(tn_requested), cap))
    return (tn // 16) * 16


@functools.partial(jax.jit, static_argnames=("tn", "gather_in_kernel"))
def pgnn_layer_forward(feature, dists_max, dists_argmax, params, *, tn=128,
                       gather_in_kernel=False):
    """Pallas implementation of PGNN_layer.forward (dist_trainable=False)."""
    N, D = feature.shape
    K = dists_max.shape[1]
    wa, wb, bh, wo, bo = params
    H = wa.shape[1]
    OUT_W = 128 * pl.cdiv(K + H, 128)   # lane-dense combined output width

    tn = _choose_tile(N, tn)
    n_pad = tn * pl.cdiv(N, tn)
    pad = n_pad - N
    if pad:
        feature = jnp.pad(feature, ((0, pad), (0, 0)))
        dists_max = jnp.pad(dists_max, ((0, pad), (0, 0)))
        dists_argmax = jnp.pad(dists_argmax, ((0, pad), (0, 0)))

    # bf16 activations/weights for the MXU path (f32 accumulation in-kernel).
    feat_bf16 = feature.astype(jnp.bfloat16)

    # -- derived, MXU-shaped weights (tiny; built once under jit) -------------
    # blockdiag_K(Wa): (K*D, K*H) so the neighbor matmul has contraction K*D
    # and a lane-dense K*H output.
    w_blk = (jnp.einsum("ij,dh->idjh", jnp.eye(K, dtype=jnp.float32), wa)
             .reshape(K * D, K * H).astype(jnp.bfloat16))
    wb_tiled = jnp.tile(wb, (1, K)).astype(jnp.bfloat16)            # (D, K*H)
    bh_tiled = jnp.tile(bh, (1, K)).astype(jnp.float32)             # (1, K*H)
    # 0/1 expansion matrix: dists (tn, K) @ e_h -> per-(anchor, hidden) scale.
    e_h = jnp.kron(jnp.eye(K, dtype=jnp.float32),
                   jnp.ones((1, H), jnp.float32))                   # (K, K*H)
    # Fused output projection: cols 0:K   -> out_position (wo per anchor block)
    #                          cols K:K+H -> out_structure (mean over anchors)
    p_pos = jnp.kron(jnp.eye(K, dtype=jnp.float32),
                     wo.astype(jnp.float32).reshape(H, 1))           # (K*H, K)
    p_str = jnp.tile(jnp.eye(H, dtype=jnp.float32), (K, 1)) / K      # (K*H, H)
    p_out = jnp.zeros((K * H, OUT_W), jnp.float32)
    p_out = p_out.at[:, :K].set(p_pos).at[:, K:K + H].set(p_str)
    b_comb = jnp.zeros((1, OUT_W), jnp.float32).at[:, :K].set(bo[0, 0])

    grid = (n_pad // tn,)
    out_shape = jax.ShapeDtypeStruct((n_pad, OUT_W), jnp.float32)
    out_spec = pl.BlockSpec((tn, OUT_W), lambda i: (i, 0))

    weight_specs = [
        pl.BlockSpec((K * D, K * H), lambda i: (0, 0)),   # w_blk
        pl.BlockSpec((D, K * H), lambda i: (0, 0)),       # wb_tiled
        pl.BlockSpec((1, K * H), lambda i: (0, 0)),       # bh_tiled
        pl.BlockSpec((K, K * H), lambda i: (0, 0)),       # e_h
        pl.BlockSpec((K * H, OUT_W), lambda i: (0, 0)),   # p_out
        pl.BlockSpec((1, OUT_W), lambda i: (0, 0)),       # b_comb
    ]

    if gather_in_kernel:
        # VMEM-resident feature table: budget so it also fits v7x (64 MiB VMEM,
        # vs 128 MiB on v5e/v6e); keep headroom for pipeline double-buffers.
        table_bytes = n_pad * D * 2
        if table_bytes > 24 * 1024 * 1024:
            raise ValueError("feature table too large for VMEM-resident "
                             "gather; use gather_in_kernel=False")
        kernel = _pgnn_kernel_vmem_gather
        in_specs = [
            pl.BlockSpec((tn, K), lambda i: (i, 0)),        # dists_argmax
            pl.BlockSpec((tn, K), lambda i: (i, 0)),        # dists_max
            pl.BlockSpec((tn, D), lambda i: (i, 0)),        # self features
            pl.BlockSpec((n_pad, D), lambda i: (0, 0)),     # feature table (VMEM)
            *weight_specs,
        ]
        args = (dists_argmax, dists_max, feat_bf16, feat_bf16,
                w_blk, wb_tiled, bh_tiled, e_h, p_out, b_comb)
        gathered_bytes = n_pad * D * 2 + n_pad * K * 4
    else:
        # XLA row gather, written directly in the lane-dense (n_pad, K*D)
        # layout the kernel wants (free row-major reshape in HBM).
        subset_flat = jnp.take(feat_bf16, dists_argmax.reshape(-1), axis=0,
                               mode="clip").reshape(n_pad, K * D)
        kernel = _pgnn_kernel_pregathered
        in_specs = [
            pl.BlockSpec((tn, K * D), lambda i: (i, 0)),    # gathered subset
            pl.BlockSpec((tn, K), lambda i: (i, 0)),        # dists_max
            pl.BlockSpec((tn, D), lambda i: (i, 0)),        # self features
            *weight_specs,
        ]
        args = (subset_flat, dists_max, feat_bf16,
                w_blk, wb_tiled, bh_tiled, e_h, p_out, b_comb)
        gathered_bytes = n_pad * K * D * 2

    flops = (2 * n_pad * (K * D) * (K * H)        # neighbor matmul
             + 2 * n_pad * D * (K * H)            # self matmul
             + 2 * n_pad * K * (K * H)            # distance expansion
             + 2 * n_pad * (K * H) * OUT_W)       # fused output projection
    bytes_accessed = (gathered_bytes + n_pad * K * 4 + n_pad * D * 2
                      + n_pad * OUT_W * 4
                      + w_blk.size * 2 + wb_tiled.size * 2
                      + 4 * (bh_tiled.size + e_h.size + p_out.size + b_comb.size))
    cost = pl.CostEstimate(flops=flops, transcendentals=0,
                           bytes_accessed=bytes_accessed)

    comb = pl.pallas_call(
        kernel,
        out_shape=out_shape,
        grid_spec=pltpu.PrefetchScalarGridSpec(
            num_scalar_prefetch=0,
            grid=grid,
            in_specs=in_specs,
            out_specs=out_spec,
        ),
        compiler_params=pltpu.CompilerParams(
            dimension_semantics=("parallel",),
            vmem_limit_bytes=32 * 1024 * 1024,
        ),
        cost_estimate=cost,
    )(*args)

    out_position = comb[:N, :K]
    out_structure = comb[:N, K:K + H]
    return out_position, out_structure


# ---------------------------------------------------------------------------
# Parameter init (mirrors the PyTorch module) and pure-JAX reference
# ---------------------------------------------------------------------------

def init_params(key, input_dim, output_dim):
    """xavier_uniform (gain=sqrt(2), ReLU) init; biases = 0."""
    gain = jnp.sqrt(2.0)
    k1, k2 = jax.random.split(key)

    # linear_hidden: torch Linear(in=2*D, out=H), weight shape (H, 2D)
    fan_in, fan_out = 2 * input_dim, output_dim
    bound = gain * jnp.sqrt(6.0 / (fan_in + fan_out))
    w_hidden = jax.random.uniform(k1, (output_dim, 2 * input_dim),
                                  minval=-bound, maxval=bound, dtype=jnp.float32)
    b_hidden = jnp.zeros((1, output_dim), jnp.float32)

    # linear_out_position: Linear(in=H, out=1), weight shape (1, H)
    fan_in2, fan_out2 = output_dim, 1
    bound2 = gain * jnp.sqrt(6.0 / (fan_in2 + fan_out2))
    w_out = jax.random.uniform(k2, (1, output_dim),
                               minval=-bound2, maxval=bound2, dtype=jnp.float32)
    b_out = jnp.zeros((1, 1), jnp.float32)

    # Split the cat-matmul: y = x_cat @ W.T ; W.T = [[Wa],[Wb]] along input dim.
    wt = w_hidden.T                      # (2D, H)
    wa = wt[:input_dim, :]               # acts on distance-scaled neighbor feats
    wb = wt[input_dim:, :]               # acts on self_feature
    return wa, wb, b_hidden, w_out, b_out


def pgnn_layer_reference(feature, dists_max, dists_argmax, params):
    """Pure-JAX f32 reference mirroring the PyTorch forward."""
    wa, wb, bh, wo, bo = params
    N, D = feature.shape
    K = dists_max.shape[1]
    subset = jnp.take(feature, dists_argmax.reshape(-1), axis=0).reshape(N, K, D)
    messages = subset * dists_max[..., None]
    self_feature = jnp.broadcast_to(feature[:, None, :], (N, K, D))
    cat = jnp.concatenate([messages, self_feature], axis=-1)          # (N, K, 2D)
    w_hidden_t = jnp.concatenate([wa, wb], axis=0)                    # (2D, H)
    msg = cat @ w_hidden_t + bh[0]
    msg = jnp.maximum(msg, 0.0)
    out_position = msg @ wo[0] + bo[0, 0]                             # (N, K)
    out_structure = jnp.mean(msg, axis=1)                             # (N, H)
    return out_position, out_structure


# ---------------------------------------------------------------------------
# Demo / self-test
# ---------------------------------------------------------------------------

if __name__ == "__main__":
    # N not a multiple of the tile (exercises the padded tail), D*K = 128 and
    # K*H = 256 (lane/MXU-friendly dims of the model config).
    N, D, K, H = 300, 16, 8, 32
    key = jax.random.PRNGKey(0)
    k_feat, k_dist, k_idx, k_param = jax.random.split(key, 4)

    feature = jax.random.normal(k_feat, (N, D), dtype=jnp.float32)
    dists_max = jax.random.uniform(k_dist, (N, K), dtype=jnp.float32)
    dists_argmax = jax.random.randint(k_idx, (N, K), 0, N, dtype=jnp.int32)
    params = init_params(k_param, D, H)

    # Tolerances account for the deliberate bf16 MXU inputs (f32 accumulation).
    ref_pos, ref_struct = pgnn_layer_reference(feature, dists_max, dists_argmax,
                                               params)

    def _matches(out):
        pos, struct = out
        return (pos.shape == (N, K) and struct.shape == (N, H)
                and bool(jnp.allclose(pos, ref_pos, atol=2e-2, rtol=2e-2))
                and bool(jnp.allclose(struct, ref_struct, atol=2e-2, rtol=2e-2)))

    outputs = None
    # Preferred path (review item 1): VMEM-resident feature table + in-kernel
    # gather.  Probed because Mosaic's arbitrary-row dynamic gather lowering is
    # version/shape dependent; fall back to the XLA-gather variant otherwise.
    try:
        cand = pgnn_layer_forward(feature, dists_max, dists_argmax, params,
                                  gather_in_kernel=True)
        jax.block_until_ready(cand)
        if _matches(cand):
            outputs = cand
    except Exception:
        outputs = None
    if outputs is None:
        outputs = pgnn_layer_forward(feature, dists_max, dists_argmax, params,
                                     gather_in_kernel=False)
        jax.block_until_ready(outputs)

    out_pos, out_struct = outputs
    assert out_pos.shape == (N, K) and out_struct.shape == (N, H)
    assert jnp.allclose(out_pos, ref_pos, atol=2e-2, rtol=2e-2)
    assert jnp.allclose(out_struct, ref_struct, atol=2e-2, rtol=2e-2)

    print("KERNEL_OK")
</pallas_src>

<mosaic_0001>
module attributes {stable_mosaic.version = 11 : i64} {
  func.func @_pgnn_kernel_pregathered(%arg0: i32, %arg1: memref<32x128xbf16, #tpu.memory_space<vmem>>, %arg2: memref<32x8xf32, #tpu.memory_space<vmem>>, %arg3: memref<32x16xbf16, #tpu.memory_space<vmem>>, %arg4: memref<128x256xbf16, #tpu.memory_space<vmem>>, %arg5: memref<16x256xbf16, #tpu.memory_space<vmem>>, %arg6: memref<1x256xf32, #tpu.memory_space<vmem>>, %arg7: memref<8x256xf32, #tpu.memory_space<vmem>>, %arg8: memref<256x128xf32, #tpu.memory_space<vmem>>, %arg9: memref<1x128xf32, #tpu.memory_space<vmem>>, %arg10: memref<32x128xf32, #tpu.memory_space<vmem>>) attributes {dimension_semantics = [#tpu.dimension_semantics<parallel>], iteration_bounds = array<i64: 10>, scalar_prefetch = 0 : i64, scratch_operands = 0 : i64, tpu.core_type = #tpu.core_type<tc>, window_params = [{transform_indices = @transform_0, window_bounds = array<i64: 32, 128>}, {transform_indices = @transform_1, window_bounds = array<i64: 32, 8>}, {transform_indices = @transform_2, window_bounds = array<i64: 32, 16>}, {pipeline_mode = #tpu.pipeline_mode<synchronous>, transform_indices = @transform_3, window_bounds = array<i64: 128, 256>}, {pipeline_mode = #tpu.pipeline_mode<synchronous>, transform_indices = @transform_4, window_bounds = array<i64: 16, 256>}, {pipeline_mode = #tpu.pipeline_mode<synchronous>, transform_indices = @transform_5, window_bounds = array<i64: 1, 256>}, {pipeline_mode = #tpu.pipeline_mode<synchronous>, transform_indices = @transform_6, window_bounds = array<i64: 8, 256>}, {pipeline_mode = #tpu.pipeline_mode<synchronous>, transform_indices = @transform_7, window_bounds = array<i64: 256, 128>}, {pipeline_mode = #tpu.pipeline_mode<synchronous>, transform_indices = @transform_8, window_bounds = array<i64: 1, 128>}, {transform_indices = @transform_9, window_bounds = array<i64: 32, 128>}]} {
    %c0 = arith.constant 0 : index
    %c0_0 = arith.constant 0 : index
    %0 = vector.load %arg1[%c0, %c0_0] : memref<32x128xbf16, #tpu.memory_space<vmem>>, vector<32x128xbf16>
    %c0_1 = arith.constant 0 : index
    %c0_2 = arith.constant 0 : index
    %1 = vector.load %arg2[%c0_1, %c0_2] : memref<32x8xf32, #tpu.memory_space<vmem>>, vector<32x8xf32>
    %c0_3 = arith.constant 0 : index
    %c0_4 = arith.constant 0 : index
    %2 = vector.load %arg3[%c0_3, %c0_4] : memref<32x16xbf16, #tpu.memory_space<vmem>>, vector<32x16xbf16>
    %c0_5 = arith.constant 0 : index
    %c0_6 = arith.constant 0 : index
    %3 = vector.load %arg4[%c0_5, %c0_6] : memref<128x256xbf16, #tpu.memory_space<vmem>>, vector<128x256xbf16>
    %c0_7 = arith.constant 0 : index
    %c0_8 = arith.constant 0 : index
    %4 = vector.load %arg5[%c0_7, %c0_8] : memref<16x256xbf16, #tpu.memory_space<vmem>>, vector<16x256xbf16>
    %c0_9 = arith.constant 0 : index
    %c0_10 = arith.constant 0 : index
    %5 = vector.load %arg6[%c0_9, %c0_10] : memref<1x256xf32, #tpu.memory_space<vmem>>, vector<1x256xf32>
    %c0_11 = arith.constant 0 : index
    %c0_12 = arith.constant 0 : index
    %6 = vector.load %arg7[%c0_11, %c0_12] : memref<8x256xf32, #tpu.memory_space<vmem>>, vector<8x256xf32>
    %c0_13 = arith.constant 0 : index
    %c0_14 = arith.constant 0 : index
    %7 = vector.load %arg8[%c0_13, %c0_14] : memref<256x128xf32, #tpu.memory_space<vmem>>, vector<256x128xf32>
    %c0_15 = arith.constant 0 : index
    %c0_16 = arith.constant 0 : index
    %8 = vector.load %arg9[%c0_15, %c0_16] : memref<1x128xf32, #tpu.memory_space<vmem>>, vector<1x128xf32>
    %cst = arith.constant dense<0.000000e+00> : vector<32x256xf32>
    %9 = tpu.matmul %0, %3, %cst {dimension_numbers = #tpu.dot_dimension_numbers<[1], [0], [0], [1], [0, 0, 1, 1], [], []>} : vector<32x128xbf16>, vector<128x256xbf16>, vector<32x256xf32> -> vector<32x256xf32>
    %cst_17 = arith.constant dense<0.000000e+00> : vector<32x256xf32>
    %10 = tpu.matmul %2, %4, %cst_17 {dimension_numbers = #tpu.dot_dimension_numbers<[1], [0], [0], [1], [0, 0, 1, 1], [], []>} : vector<32x16xbf16>, vector<16x256xbf16>, vector<32x256xf32> -> vector<32x256xf32>
    %11 = vector.broadcast %5 : vector<1x256xf32> to vector<32x256xf32>
    %12 = arith.addf %10, %11 : vector<32x256xf32>
    %cst_18 = arith.constant dense<0.000000e+00> : vector<32x256xf32>
    %13 = tpu.matmul %1, %6, %cst_18 {dimension_numbers = #tpu.dot_dimension_numbers<[1], [0], [0], [1], [0, 0, 1, 1], [], []>} : vector<32x8xf32>, vector<8x256xf32>, vector<32x256xf32> -> vector<32x256xf32>
    %14 = arith.mulf %9, %13 : vector<32x256xf32>
    %15 = arith.addf %14, %12 : vector<32x256xf32>
    %cst_19 = arith.constant 0.000000e+00 : f32
    %16 = vector.broadcast %cst_19 : f32 to vector<32x256xf32>
    %17 = arith.maximumf %15, %16 : vector<32x256xf32>
    %cst_20 = arith.constant dense<0.000000e+00> : vector<32x128xf32>
    %18 = tpu.matmul %17, %7, %cst_20 {dimension_numbers = #tpu.dot_dimension_numbers<[1], [0], [0], [1], [0, 0, 1, 1], [], []>} : vector<32x256xf32>, vector<256x128xf32>, vector<32x128xf32> -> vector<32x128xf32>
    %19 = vector.broadcast %8 : vector<1x128xf32> to vector<32x128xf32>
    %20 = arith.addf %18, %19 : vector<32x128xf32>
    %c0_21 = arith.constant 0 : index
    %c0_22 = arith.constant 0 : index
    %21 = vector.load %arg10[%c0_21, %c0_22] : memref<32x128xf32, #tpu.memory_space<vmem>>, vector<32x128xf32>
    tpu.vector_store %arg10[%c0_21, %c0_22], %20 {strides = array<i32>} : memref<32x128xf32, #tpu.memory_space<vmem>>, vector<32x128xf32>,
    return
  }
  func.func @transform_0(%arg0: i32) -> (i32, i32) {
    %c0_i32 = arith.constant 0 : i32
    %c0_i32_0 = arith.constant 0 : i32
    return %arg0, %c0_i32 : i32, i32
  }
  func.func @transform_1(%arg0: i32) -> (i32, i32) {
    %c0_i32 = arith.constant 0 : i32
    %c0_i32_0 = arith.constant 0 : i32
    return %arg0, %c0_i32 : i32, i32
  }
  func.func @transform_2(%arg0: i32) -> (i32, i32) {
    %c0_i32 = arith.constant 0 : i32
    %c0_i32_0 = arith.constant 0 : i32
    return %arg0, %c0_i32 : i32, i32
  }
  func.func @transform_3(%arg0: i32) -> (i32, i32) {
    %c0_i32 = arith.constant 0 : i32
    %c0_i32_0 = arith.constant 0 : i32
    %c0_i32_1 = arith.constant 0 : i32
    return %c0_i32, %c0_i32_0 : i32, i32
  }
  func.func @transform_4(%arg0: i32) -> (i32, i32) {
    %c0_i32 = arith.constant 0 : i32
    %c0_i32_0 = arith.constant 0 : i32
    %c0_i32_1 = arith.constant 0 : i32
    return %c0_i32, %c0_i32_0 : i32, i32
  }
  func.func @transform_5(%arg0: i32) -> (i32, i32) {
    %c0_i32 = arith.constant 0 : i32
    %c0_i32_0 = arith.constant 0 : i32
    %c0_i32_1 = arith.constant 0 : i32
    return %c0_i32, %c0_i32_0 : i32, i32
  }
  func.func @transform_6(%arg0: i32) -> (i32, i32) {
    %c0_i32 = arith.constant 0 : i32
    %c0_i32_0 = arith.constant 0 : i32
    %c0_i32_1 = arith.constant 0 : i32
    return %c0_i32, %c0_i32_0 : i32, i32
  }
  func.func @transform_7(%arg0: i32) -> (i32, i32) {
    %c0_i32 = arith.constant 0 : i32
    %c0_i32_0 = arith.constant 0 : i32
    %c0_i32_1 = arith.constant 0 : i32
    return %c0_i32, %c0_i32_0 : i32, i32
  }
  func.func @transform_8(%arg0: i32) -> (i32, i32) {
    %c0_i32 = arith.constant 0 : i32
    %c0_i32_0 = arith.constant 0 : i32
    %c0_i32_1 = arith.constant 0 : i32
    return %c0_i32, %c0_i32_0 : i32, i32
  }
  func.func @transform_9(%arg0: i32) -> (i32, i32) {
    %c0_i32 = arith.constant 0 : i32
    %c0_i32_0 = arith.constant 0 : i32
    return %arg0, %c0_i32 : i32, i32
  }
}

</mosaic_0001>

<bundles_post_ra>
// kernel: pgnn_layer_forward.1
= control target key start
LH: loop header
LB: loop body
LE: loop exit
PB: predicated region body
PF: predicated region fallthrough
CT: control target
= control target key end

     0   :  { %s1175_s30 = smov 0   ;;  %s1386_s0 = inlined_call_operand.vmem [shape: bf16[320,128], index: 0, kind: input, shape index: {}]   ;;  %s1387_s1 = inlined_call_operand.vmem [shape: f32[320,8], index: 1, kind: input, shape index: {}]   ;;  %s1388_s2 = inlined_call_operand.vmem [shape: bf16[320,16], index: 2, kind: input, shape index: {}]   ;;  %s1389_s3 = inlined_call_operand.vmem [shape: bf16[128,256], index: 3, kind: input, shape index: {}]   ;;  %s1390_s4 = inlined_call_operand.vmem [shape: bf16[16,256], index: 4, kind: input, shape index: {}]   ;;  %s1391_s5 = inlined_call_operand.vmem [shape: f32[1,256], index: 5, kind: input, shape index: {}]   ;;  %s1392_s6 = inlined_call_operand.vmem [shape: f32[8,256], index: 6, kind: input, shape index: {}]   ;;  %s1393_s7 = inlined_call_operand.vmem [shape: f32[256,128], index: 7, kind: input, shape index: {}]   ;;  %s1394_s8 = inlined_call_operand.vmem [shape: f32[1,128], index: 8, kind: input, shape index: {}]   ;;  %s1395_s9 = inlined_call_operand.vmem [shape: f32[320,128], index: 9, kind: output, shape index: {}]  }
   0x1 LB: > { %s984_s10 = sadd.s32 4294967295, %s1121_s30   ;;  %p988_p0 = scmp.ge.s32.totalorder %s1121_s30, 1  ;;  %s1121_s30 = sphi %s1175_s30, %s19_s30  }
   0x2   : > { %p310_p1 = scmp.lt.s32.totalorder %s1121_s30, 11 }
   0x4   : > { %p311_p2 = pnand %p988_p0, %p310_p1 }
   0x5   : > { %s989_s13 = sshll.u32 (!%p311_p2), %s984_s10, 2 }
   0x6   : > { %314 = sbr.rel (%p311_p2) target bundleno = 475 (0x1db), region = 56  ;;  %p357_p3 = scmp.lt.s32.totalorder (!%p311_p2), %s989_s13, 39 }
   0xb   : > { %v1084_v0 = vld [vmem:[%s1389_s3 + $0x74] ss:$8 sps:$4 sm:$0xff]   ;;  %v1086_v1 = vld [vmem:[%s1389_s3 + $0x70] ss:$8 sps:$4 sm:$0xff]   ;;  %v1123_v2 = vmov 0   ;;  %s1397_s13 = smov (!%p357_p3, %s989_s13), 39 }
   0xc   : > { %672 = vmatprep.mubr.bf16.mxu1 %v1123_v2  ;;  %571 = vmatprep.mubr.bf16.mxu0 %v1123_v2  ;;  %v1087_v3 = vld [vmem:[%s1389_s3 + $0x64] ss:$8 sps:$4 sm:$0xff]   ;;  %v1089_v4 = vld [vmem:[%s1389_s3 + $0x60] ss:$8 sps:$4 sm:$0xff]   ;;  %v1090_v5 = vld [vmem:[%s1389_s3 + $0x54] ss:$8 sps:$4 sm:$0xff]  }
   0xd   : > { %539 = vmatprep.subr.bf16.mxu0 %v1084_v0  ;;  %s990_s22 = sshll.u32 %s1397_s13, 2  ;;  %v1092_v6 = vld [vmem:[%s1389_s3 + $0x50] ss:$8 sps:$4 sm:$0xff]   ;;  %v1093_v7 = vld [vmem:[%s1389_s3 + $0x44] ss:$8 sps:$4 sm:$0xff]   ;;  %vm623_vm0 = vcmask 130048  }
   0xe   : > { %540 = vmatpush1.bf16.msra.mxu0 %v1086_v1  ;;  %v1101_v8 = vld [vmem:[%s1390_s4 + $0x4] ss:$8 sps:$4 sm:$0xff]   ;;  %s1215_s11 = scalar_lea.vmem %s1388_s2, %s990_s22  ;;  %v1104_v9 = vld [vmem:[%s1390_s4] ss:$8 sps:$4 sm:$0xff]   ;;  %v1096_v12 = vld [vmem:[%s1389_s3 + $0x34] ss:$8 sps:$4 sm:$0xff]   ;;  %s1233_s24 = scalar_lea.vmem %s1386_s0, %s990_s22 }
   0xf   : > { %541 = vmatprep.subr.bf16.mxu0 %v1087_v3  ;;  %v1095_v10 = vld [vmem:[%s1389_s3 + $0x40] ss:$8 sps:$4 sm:$0xff]   ;;  %1072 = vmatprep.subr.bf16.mxu1 %v1101_v8  ;;  %s992_s25 = sshll.u32 %s1397_s13, 3  ;;  %v1098_v15 = vld [vmem:[%s1389_s3 + $0x30] ss:$8 sps:$4 sm:$0xff]   ;;  %v1124_v17 = vmov 0.0  }
  0x10   : > { %1073 = vmatpush1.bf16.msra.mxu1 %v1104_v9  ;;  %v1107_v11 = vld [vmem:[%s1215_s11 + $0x8] sm:$0xff]   ;;  %v412_v14 = vld [vmem:[%s1392_s6] sm:$0xff]  ;;  %s366_s15 = scalar_lea.vmem %s1387_s1, %s992_s25  ;;  %vm683_vm1 = vcmask 64512   ;;  %v1105_v20 = vld [vmem:[%s1389_s3 + $0x14] ss:$8 sps:$4 sm:$0xff]   ;;  %s378_s27 = scalar_lea.vmem %s1395_s9, %s992_s25 }
  0x11   : > { %v413_v13 = vld [vmem:[%s1392_s6 + $0x8] sm:$0xff]  ;;  %v385_v19 = vld [vmem:[%s366_s15] sm:$0xff]  ;;  %v1108_v21 = vld [vmem:[%s1389_s3 + $0x10] ss:$8 sps:$4 sm:$0xff]  }
  0x12   : > { %542 = vmatpush1.bf16.msra.mxu0 %v1089_v4  ;;  %726 = vmatprep.subr.mxu1 %v413_v13  ;;  %v1099_v16 = vld [vmem:[%s1389_s3 + $0x24] ss:$8 sps:$4 sm:$0xff]   ;;  %v1103_v18 = vld [vmem:[%s1389_s3 + $0x20] ss:$8 sps:$4 sm:$0xff]   ;;  %v387_v25 = vld [vmem:[%s366_s15 + $0x10] sm:$0xff] }
  0x13   : > { %543 = vmatprep.subr.bf16.mxu0 %v1090_v5  ;;  %1020 = vmatmul.mubr.msk.bf16.vlgmr.msra.gmra.mxu1 %vm623_vm0, %v1107_v11  ;;  %v386_v22 = vld [vmem:[%s366_s15 + $0x8] sm:$0xff]  ;;  %v1112_v26 = vld [vmem:[%s1233_s24] sm:$0xff]   ;;  %v388_v27 = vld [vmem:[%s366_s15 + $0x18] sm:$0xff] }
  0x14   : > { %727 = vmatpush1.msra.mxu1 %v412_v14  ;;  %760 = vmatprep.mubr.f32.mxu1 %v1124_v17  ;;  %v1109_v23 = vld [vmem:[%s1389_s3 + $0x4] ss:$8 sps:$4 sm:$0xff]   ;;  %v1111_v24 = vld [vmem:[%s1389_s3] ss:$8 sps:$4 sm:$0xff]   ;;  %v445_v30 = vld [vmem:[%s1393_s7 + $0xf8] sm:$0xff] }
  0x15   : > { %v1113_v28 = vld [vmem:[%s1233_s24 + $0x8] sm:$0xff]   ;;  %v1114_v29 = vld [vmem:[%s1215_s11] sm:$0xff]   ;;  %v429_v31 = vld [vmem:[%s1393_s7 + $0x78] sm:$0xff]  ;;  %1028 = vmatprep.subr.mxu1 %v445_v30 }
  0x16   : > { %544 = vmatpush1.bf16.msra.mxu0 %v1092_v6  ;;  %v444_v32 = vld [vmem:[%s1393_s7 + $0xf0] sm:$0xff]  ;;  %v443_v34 = vld [vmem:[%s1393_s7 + $0xe8] sm:$0xff]  ;;  %v442_v36 = vld [vmem:[%s1393_s7 + $0xe0] sm:$0xff] }
  0x17   : > { %545 = vmatprep.subr.bf16.mxu0 %v1093_v7  ;;  %v428_v33 = vld [vmem:[%s1393_s7 + $0x70] sm:$0xff]  ;;  %v427_v35 = vld [vmem:[%s1393_s7 + $0x68] sm:$0xff]  ;;  %v426_v37 = vld [vmem:[%s1393_s7 + $0x60] sm:$0xff]  ;;  %v593_v7 = vlaneseq }
  0x18   : > { %v441_v38 = vld [vmem:[%s1393_s7 + $0xd8] sm:$0xff]  ;;  %v440_v40 = vld [vmem:[%s1393_s7 + $0xd0] sm:$0xff]  ;;  %v439_v42 = vld [vmem:[%s1393_s7 + $0xc8] sm:$0xff] }
  0x19   : > { %v425_v39 = vld [vmem:[%s1393_s7 + $0x58] sm:$0xff]  ;;  %v424_v41 = vld [vmem:[%s1393_s7 + $0x50] sm:$0xff]  ;;  %v423_v43 = vld [vmem:[%s1393_s7 + $0x48] sm:$0xff]  ;;  %v594_v11 = vshrl.u32 %v593_v7, 7 }
  0x1a   : > { %546 = vmatpush1.bf16.msra.mxu0 %v1095_v10  ;;  %v438_v44 = vld [vmem:[%s1393_s7 + $0xc0] sm:$0xff]  ;;  %v437_v46 = vld [vmem:[%s1393_s7 + $0xb8] sm:$0xff]  ;;  %v436_v48 = vld [vmem:[%s1393_s7 + $0xb0] sm:$0xff] }
  0x1b   : > { %547 = vmatprep.subr.bf16.mxu0 %v1096_v12  ;;  %1021 = vmatmul.mubr.msk.f32.vlgmr.msra.gmra.mxu1 %vm683_vm1, %v385_v19  ;;  %v422_v45 = vld [vmem:[%s1393_s7 + $0x40] sm:$0xff]  ;;  %v421_v47 = vld [vmem:[%s1393_s7 + $0x38] sm:$0xff]  ;;  %v420_v49 = vld [vmem:[%s1393_s7 + $0x30] sm:$0xff] }
  0x1c   : > { %766 = vmatprep.mubr.f32.mxu1 %v1124_v17  ;;  %1029 = vmatpush3.msra.mxu1 %v429_v31  ;;  %v435_v50 = vld [vmem:[%s1393_s7 + $0xa8] sm:$0xff]  ;;  %v434_v52 = vld [vmem:[%s1393_s7 + $0xa0] sm:$0xff]  ;;  %v433_v54 = vld [vmem:[%s1393_s7 + $0x98] sm:$0xff] }
  0x1d   : > { %1030 = vmatprep.subr.mxu1 %v444_v32  ;;  %v419_v51 = vld [vmem:[%s1393_s7 + $0x28] sm:$0xff]  ;;  %v418_v53 = vld [vmem:[%s1393_s7 + $0x20] sm:$0xff]  ;;  %v417_v55 = vld [vmem:[%s1393_s7 + $0x18] sm:$0xff] }
  0x1e   : > { %548 = vmatpush1.bf16.msra.mxu0 %v1098_v15  ;;  %1031 = vmatpush3.msra.mxu1 %v428_v33  ;;  %v432_v56 = vld [vmem:[%s1393_s7 + $0x90] sm:$0xff]  ;;  %v431_v58 = vld [vmem:[%s1393_s7 + $0x88] sm:$0xff]  ;;  %v430_v60 = vld [vmem:[%s1393_s7 + $0x80] sm:$0xff]  ;;  %v595_v15 = vsub.s32 0, %v594_v11 }
  0x1f   : > { %549 = vmatprep.subr.bf16.mxu0 %v1099_v16  ;;  %1022 = vmatmul.mubr.msk.f32.gmra.mxu1 %vm683_vm1, %v386_v22  ;;  %v416_v57 = vld [vmem:[%s1393_s7 + $0x10] sm:$0xff]  ;;  %v415_v59 = vld [vmem:[%s1393_s7 + $0x8] sm:$0xff]  ;;  %v414_v61 = vld [vmem:[%s1393_s7] sm:$0xff] }
  0x20   : > { %772 = vmatprep.mubr.f32.mxu1 %v1124_v17  ;;  %1032 = vmatprep.subr.mxu1 %v443_v34  ;;  %v411_v16 = vld [vmem:[%s1391_s5] sm:$0x3] }
  0x21   : > { %1033 = vmatpush3.msra.mxu1 %v427_v35 }
  0x22   : > { %550 = vmatpush1.bf16.msra.mxu0 %v1103_v18  ;;  %1034 = vmatprep.subr.mxu1 %v442_v36  ;;  %v599_v18 = vsub.s32 1, %v594_v11 }
  0x23   : > { %551 = vmatprep.subr.bf16.mxu0 %v1105_v20  ;;  %1023 = vmatmul.mubr.msk.f32.gmra.mxu1 %vm683_vm1, %v387_v25 }
  0x24   : > { %778 = vmatprep.mubr.f32.mxu1 %v1124_v17  ;;  %1035 = vmatpush3.msra.mxu1 %v426_v37 }
  0x25   : > { %1036 = vmatprep.subr.mxu1 %v441_v38 }
  0x26   : > { %552 = vmatpush1.bf16.msra.mxu0 %v1108_v21  ;;  %1037 = vmatpush3.msra.mxu1 %v425_v39  ;;  %v596_v21 = vrot.slane %v411_v16, %v595_v15 }
  0x27   : > { %553 = vmatprep.subr.bf16.mxu0 %v1109_v23  ;;  %1024 = vmatmul.mubr.msk.f32.gmra.mxu1 %vm683_vm1, %v388_v27  ;;  %v600_v23 = vrot.slane %v411_v16, %v599_v18 }
  0x28   : > { %1038 = vmatprep.subr.mxu1 %v440_v40 }
  0x29   : > { %1039 = vmatpush3.msra.mxu1 %v424_v41 }
  0x2a   : > { %554 = vmatpush1.bf16.msra.mxu0 %v1111_v24  ;;  %1040 = vmatprep.subr.mxu1 %v439_v42 }
  0x2b   : > { %644 = vmatprep.subr.bf16.mxu0 %v1101_v8  ;;  %1041 = vmatpush3.msra.mxu1 %v423_v43 }
  0x2c   : > { %1042 = vmatprep.subr.mxu1 %v438_v44 }
  0x2d   : > { %572 = vmatmul.mubr.bf16.vlgmr.msra.gmra.mxu0 %v1112_v26  ;;  %1043 = vmatpush3.msra.mxu1 %v422_v45 }
  0x2e   : > { %645 = vmatpush1.bf16.msra.mxu0 %v1104_v9  ;;  %581 = vmatprep.mubr.bf16.mxu0 %v1123_v2 }
  0x2f   : > { %1044 = vmatprep.subr.mxu1 %v437_v46 }
  0x30   : > { %1045 = vmatpush3.msra.mxu1 %v421_v47 }
  0x31   : > { %1046 = vmatprep.subr.mxu1 %v436_v48 }
  0x32   : > { %1047 = vmatpush3.msra.mxu1 %v420_v49 }
  0x33   : > { %1048 = vmatprep.subr.mxu1 %v435_v50 }
  0x34   : > { %1049 = vmatpush3.msra.mxu1 %v419_v51 }
  0x35   : > { %582 = vmatmul.mubr.bf16.gmra.mxu0 %v1113_v28  ;;  %1050 = vmatprep.subr.mxu1 %v434_v52 }
  0x36   : > { %662 = vmatprep.mubr.bf16.mxu0 %v1123_v2  ;;  %1051 = vmatpush3.msra.mxu1 %v418_v53 }
  0x37   : > { %1052 = vmatprep.subr.mxu1 %v433_v54 }
  0x38   : > { %1053 = vmatpush3.msra.mxu1 %v417_v55 }
  0x39   : > { %1054 = vmatprep.subr.mxu1 %v432_v56 }
  0x3a   : > { %1055 = vmatpush3.msra.mxu1 %v416_v57 }
  0x3b   : > { %1056 = vmatprep.subr.mxu1 %v431_v58 }
  0x3c   : > { %1057 = vmatpush3.msra.mxu1 %v415_v59 }
  0x3d   : > { %1019 = vmatmul.mubr.msk.bf16.vlgmr.msra.gmra.mxu0 %vm623_vm0, %v1114_v29  ;;  %1058 = vmatprep.subr.mxu1 %v430_v60 }
  0x3e   : > { %1059 = vmatpush3.msra.mxu1 %v414_v61 }
  0xd3   : > { %v674_v62 = vpop.f32.mrf.mxu1 }
  0xd4   : > { %v675_v42 = vadd.f32 %v674_v62, %v596_v21  ;;  %v1025_v62 = vld [vmem:[%s1394_s8] ss:$0 sm:$0xff] }
  0xd5   : > { %v676_v63 = vpop.f32.mrf.mxu1 }
  0xd6   : > { %v677_v38 = vadd.f32 %v676_v63, %v600_v23 }
  0xd7   : > { %v678_v0 = vpop.f32.mrf.mxu1 }
  0xd8   : > { %v679_v56 = vadd.f32 %v678_v0, %v596_v21 }
  0xd9   : > { %v680_v1 = vpop.f32.mrf.mxu1 }
  0xda   : > { %v681_v49 = vadd.f32 %v680_v1, %v600_v23 }
  0xdb   : > { %v762_v2 = vpop.f32.mrf.mxu1 }
  0xdd   : > { %v764_v3 = vpop.f32.mrf.mxu1 }
  0xdf   : > { %v768_v6 = vpop.f32.mrf.mxu1 }
  0xe1   : > { %v770_v10 = vpop.f32.mrf.mxu1 }
  0xe3   : > { %v774_v13 = vpop.f32.mrf.mxu1 }
  0xe5   : > { %v776_v19 = vpop.f32.mrf.mxu1 }
  0xe7   : > { %v780_v26 = vpop.f32.mrf.mxu1 }
  0xe9   : > { %v782_v36 = vpop.f32.mrf.mxu1 }
  0xed   : > { %v573_v4 = vpop.f32.mrf.mxu0 }
  0xee   : > { %v785_v25 = vmul.f32 %v762_v2, %v573_v4 }
  0xef   : > { %v575_v5 = vpop.f32.mrf.mxu0 }
  0xf0   : > { %v786_v28 = vmul.f32 %v764_v3, %v575_v5 }
  0xf1   : > { %v577_v8 = vpop.f32.mrf.mxu0 }
  0xf2   : > { %v787_v35 = vmul.f32 %v768_v6, %v577_v8 }
  0xf3   : > { %v579_v9 = vpop.f32.mrf.mxu0 }
  0xf4   : > { %v788_v39 = vmul.f32 %v770_v10, %v579_v9 }
  0xf5   : > { %v583_v12 = vpop.f32.mrf.mxu0 }
  0xf6   : > { %v789_v43 = vmul.f32 %v774_v13, %v583_v12 }
  0xf7   : > { %v585_v14 = vpop.f32.mrf.mxu0 }
  0xf8   : > { %v790_v32 = vmul.f32 %v776_v19, %v585_v14  ;;  %v797_v51 = vadd.f32 %v789_v43, %v675_v42 }
  0xf9   : > { %v587_v17 = vpop.f32.mrf.mxu0 }
  0xfa   : > { %v798_v46 = vadd.f32 %v790_v32, %v677_v38  ;;  %v791_v52 = vmul.f32 %v780_v26, %v587_v17  ;;  %v805_v57 = vmax.f32 %v797_v51, 0.0 }
  0xfb   : > { %v589_v20 = vpop.f32.mrf.mxu0 }
  0xfc   : > { %v792_v47 = vmul.f32 %v782_v36, %v589_v20  ;;  %v806_v54 = vmax.f32 %v798_v46, 0.0  ;;  %v799_v58 = vadd.f32 %v791_v52, %v679_v56 }
  0xfd   : > { %v664_v22 = vpop.f32.mrf.mxu0 }
  0xfe   : > { %v665_v24 = vadd.f32 %v664_v22, %v596_v21  ;;  %v800_v55 = vadd.f32 %v792_v47, %v681_v49  ;;  %v807_v60 = vmax.f32 %v799_v58, 0.0 }
  0xff   : > { %v666_v27 = vpop.f32.mrf.mxu0 }
 0x100   : > { %v667_v29 = vadd.f32 %v666_v27, %v600_v23  ;;  %v793_v30 = vadd.f32 %v785_v25, %v665_v24  ;;  %v808_v59 = vmax.f32 %v800_v55, 0.0 }
 0x101   : > { %v668_v31 = vpop.f32.mrf.mxu0 }
 0x102   : > { %v794_v33 = vadd.f32 %v786_v28, %v667_v29  ;;  %v669_v34 = vadd.f32 %v668_v31, %v596_v21  ;;  %v801_v44 = vmax.f32 %v793_v30, 0.0 }
 0x103   : > { %v670_v37 = vpop.f32.mrf.mxu0 }
 0x104   : > { %v802_v40 = vmax.f32 %v794_v33, 0.0  ;;  %v671_v41 = vadd.f32 %v670_v37, %v600_v23  ;;  %v795_v45 = vadd.f32 %v787_v35, %v669_v34 }
 0x106   : > { %v796_v48 = vadd.f32 %v788_v39, %v671_v41  ;;  %879 = vmatprep.mubr.f32.mxu1 %v802_v40  ;;  %v803_v53 = vmax.f32 %v795_v45, 0.0 }
 0x107   : > { %880 = vmatmul.mubr.f32.vlgmr.msra.gmra.mxu1 %v801_v44 }
 0x108   : > { %v804_v50 = vmax.f32 %v796_v48, 0.0 }
 0x10a   : > { %884 = vmatprep.mubr.f32.mxu1 %v804_v50 }
 0x10b   : > { %885 = vmatmul.mubr.f32.gmra.mxu1 %v803_v53 }
 0x10c   : > { %889 = vmatprep.mubr.f32.mxu1 %v806_v54 }
 0x10f   : > { %890 = vmatmul.mubr.f32.gmra.mxu1 %v805_v57 }
 0x110   : > { %894 = vmatprep.mubr.f32.mxu1 %v808_v59 }
 0x113   : > { %895 = vmatmul.mubr.f32.gmra.mxu1 %v807_v60 }
 0x1c7   : > { %v1060_v61 = vpop.f32.mrf.mxu1 }
 0x1c9   : > { %v1061_v63 = vpop.f32.mrf.mxu1 }
 0x1ca   : > { %v1062_v1 = vadd.f32 %v1061_v63, %v1060_v61 }
 0x1cb   : > { %v1063_v0 = vpop.f32.mrf.mxu1 }
 0x1cc   : > { %v882_v2 = vadd.f32 %v1062_v1, %v1025_v62 }
 0x1cd   : > { %v1064_v3 = vpop.f32.mrf.mxu1 }
 0x1ce   : > { %900 = vst [vmem:[%s378_s27] sm:$0xff] %v882_v2  ;;  %v1065_v4 = vadd.f32 %v1064_v3, %v1063_v0 }
 0x1cf   : > { %v1066_v5 = vpop.f32.mrf.mxu1 }
 0x1d0   : > { %v887_v6 = vadd.f32 %v1065_v4, %v1025_v62 }
 0x1d1   : > { %v1067_v7 = vpop.f32.mrf.mxu1 }
 0x1d2   : > { %901 = vst [vmem:[%s378_s27 + $0x8] sm:$0xff] %v887_v6  ;;  %v1068_v8 = vadd.f32 %v1067_v7, %v1066_v5 }
 0x1d3   : > { %v1069_v9 = vpop.f32.mrf.mxu1 }
 0x1d4   : > { %v892_v10 = vadd.f32 %v1068_v8, %v1025_v62 }
 0x1d5   : > { %v1070_v11 = vpop.f32.mrf.mxu1 }
 0x1d6   : > { %902 = vst [vmem:[%s378_s27 + $0x10] sm:$0xff] %v892_v10  ;;  %v1071_v12 = vadd.f32 %v1070_v11, %v1069_v9 }
 0x1d8   : > { %v897_v13 = vadd.f32 %v1071_v12, %v1025_v62 }
 0x1da   : > { %903 = vst [vmem:[%s378_s27 + $0x18] sm:$0xff] %v897_v13 }
 0x1db PF: > { %s19_s30 = sadd.s32 1, %s1121_s30  }
 0x1dc   : > { %p16_p4 = scmp.ge.s32.totalorder %s19_s30, 12  }
 0x1de   :  { %18 = sbr.rel (!%p16_p4) target bundleno = 1 (0x1), region = 92 }

</bundles_post_ra>
